<compile_context>
chip_gen: v5e
topology: v5e:2x2
jax: 0.10.0
libtpu: 0.0.40
codegen_flags: <defaults>
</compile_context>

<pallas_src>
import numpy as np
import jax
import jax.numpy as jnp
from jax import lax
from jax.experimental import pallas as pl
from jax.experimental.pallas import tpu as pltpu

# Padded-node diagonal: far above the spectrum of a normalized Laplacian
# (<= ~2 for symmetric graphs) but small enough that the f32 batched eigh
# keeps full absolute accuracy on the small valid eigenvalues.
_PAD_DIAG = 1.0e4


def _round_up(x, m):
    return ((x + m - 1) // m) * m


def _vmem_capacity_bytes():
    try:
        cap = getattr(pltpu.get_tpu_info(), "vmem_capacity_bytes", None)
        if cap:
            return int(cap)
    except Exception:
        pass
    return 64 << 20          # conservative default (v7x per-TensorCore VMEM)


def _laplacian_kernel(ncnt_ref, edges_ref, l_ref):
    """Normalized Laplacians for one tile of G_TILE graphs.

    ncnt_ref:  SMEM int32 [G_pad]             per-graph node counts (prefetch)
    edges_ref: VMEM int32 [G_TILE, 2, E_pad]  row 0 = src, row 1 = dst, -1 pad
    l_ref:     VMEM f32   [G_TILE, n_pad, n_pad]
    """
    g_tile, n_pad, _ = l_ref.shape
    e_pad = edges_ref.shape[2]
    t = pl.program_id(0)

    # Graph-independent constants hoisted out of the per-graph loop
    # (JAX does not CSE broadcast_in_dim).
    node_ids = lax.broadcasted_iota(jnp.int32, (n_pad, e_pad), 0)
    i_ids = lax.broadcasted_iota(jnp.int32, (n_pad, n_pad), 0)
    j_ids = lax.broadcasted_iota(jnp.int32, (n_pad, n_pad), 1)
    is_diag = i_ids == j_ids
    ones_col = jnp.ones((e_pad, 1), jnp.bfloat16)
    ones_row = jnp.ones((1, e_pad), jnp.bfloat16)

    for g in range(g_tile):                      # static, fully unrolled
        ed = edges_ref[g]                        # [2, E_pad] int32
        src = ed[0:1, :]                         # [1, E_pad] lane-dense
        dst = ed[1:2, :]                         # [1, E_pad]

        # One-hot incidence, already in [n_pad, E_pad] orientation
        # (0/1 exact in bf16; padding edges (-1) match no node id).
        oh_src = (node_ids == src).astype(jnp.bfloat16)
        oh_dst = (node_ids == dst).astype(jnp.bfloat16)

        # Dense adjacency on the MXU: A[i, j] = #edges with (src=i, dst=j).
        a = lax.dot_general(
            oh_src, oh_dst,
            dimension_numbers=(((1,), (1,)), ((), ())),
            preferred_element_type=jnp.float32)           # [n_pad, n_pad]

        # Out-degree (degree of edge_index[0]) in both orientations via tiny
        # ones-vector MXU matvecs (exact integer sums in f32 accumulation).
        deg_col = lax.dot_general(
            oh_src, ones_col,
            dimension_numbers=(((1,), (0,)), ((), ())),
            preferred_element_type=jnp.float32)           # [n_pad, 1]
        deg_row = lax.dot_general(
            ones_row, oh_src,
            dimension_numbers=(((1,), (1,)), ((), ())),
            preferred_element_type=jnp.float32)           # [1, n_pad]

        dinv_col = lax.rsqrt(deg_col + 1e-6)
        dinv_row = lax.rsqrt(deg_row + 1e-6)

        # Identity on the valid block; large diagonal on padded rows >= n so a
        # batched eigh over padded matrices keeps padded modes above the k
        # smallest eigenpairs.
        n_g = ncnt_ref[t * g_tile + g]
        diag_val = jnp.where(i_ids >= n_g, _PAD_DIAG, 1.0)
        eye_pad = jnp.where(is_diag, diag_val, 0.0)

        # D^-1/2 scaling kept as an exact f32 post-multiply.
        l_ref[g] = eye_pad - (dinv_col * a) * dinv_row


def build_laplacians_pallas(edge_lists, n_counts, n_max):
    """One batched Pallas call -> padded Laplacians [G_pad, n_pad, n_pad] f32.

    edge_lists: list of (src, dst) int arrays with *local* node ids.
    n_counts:   per-graph node counts.
    n_max:      max node count over the graphs.
    """
    # TODO(synk): for n_pad >~ 1k (v7x, 64 MiB VMEM) / ~2k (v5e/v6e) switch to
    # an (i, j, E-chunk) tiled grid with an f32 VMEM accumulator; this
    # block-per-graph kernel is sized for small/medium graphs.
    g = len(edge_lists)
    e_max = max([int(len(s)) for s, _ in edge_lists] + [1])
    e_pad = 128 if e_max <= 128 else _round_up(e_max, 256)   # few compile buckets
    n_pad = max(128, _round_up(int(n_max), 128))

    # Several small graphs per grid step to amortize per-step overhead.
    if n_pad <= 128:
        g_tile = 8
    elif n_pad <= 256:
        g_tile = 4
    else:
        g_tile = 1
    g_tile = max(1, min(g_tile, g))
    g_pad = _round_up(g, g_tile)

    edges = np.full((g_pad, 2, e_pad), -1, dtype=np.int32)
    for gi, (src, dst) in enumerate(edge_lists):
        e = int(len(src))
        if e:
            edges[gi, 0, :e] = np.asarray(src, np.int32)
            edges[gi, 1, :e] = np.asarray(dst, np.int32)
    edges = jnp.asarray(edges)

    ncnt = np.zeros((g_pad,), np.int32)
    ncnt[:g] = np.asarray(n_counts, np.int32)
    ncnt = jnp.asarray(ncnt)

    # VMEM budget: double-buffered int32 edge block (sublanes padded to 8) +
    # double-buffered f32 output block + bf16 one-hots + f32 temporaries.
    est = (2 * g_tile * 8 * e_pad * 4
           + 2 * g_tile * n_pad * n_pad * 4
           + 2 * n_pad * e_pad * 2
           + 4 * n_pad * n_pad * 4)
    cap = _vmem_capacity_bytes()
    vmem_limit = int(min(max(2 * est, 32 << 20), (cap * 4) // 5))

    return pl.pallas_call(
        _laplacian_kernel,
        out_shape=jax.ShapeDtypeStruct((g_pad, n_pad, n_pad), jnp.float32),
        grid_spec=pltpu.PrefetchScalarGridSpec(
            num_scalar_prefetch=1,
            grid=(g_pad // g_tile,),
            in_specs=[pl.BlockSpec((g_tile, 2, e_pad),
                                   lambda i, n_ref: (i, 0, 0))],
            out_specs=pl.BlockSpec((g_tile, n_pad, n_pad),
                                   lambda i, n_ref: (i, 0, 0)),
        ),
        compiler_params=pltpu.CompilerParams(
            dimension_semantics=("parallel",),   # graph-tile axis -> megacore
            vmem_limit_bytes=vmem_limit,
        ),
    )(ncnt, edges)


def laplacian_positional_encoding(edge_index, batch, N, k):
    """JAX/Pallas equivalent of LaplacianPositionalEncoding.forward."""
    edge_index = np.asarray(edge_index)
    batch = np.asarray(batch)
    if N == 0 or batch.size == 0:
        return jnp.zeros((N, k), jnp.float32)

    # Host-side per-graph extraction + relabeling (ragged, data-dependent —
    # mirrors extract_individual_graphs / subgraph(relabel_nodes=True)).
    graphs = []
    node_gid = np.zeros(N, np.int32)   # compact graph index of each node
    node_loc = np.zeros(N, np.int32)   # local (relabeled) node id
    node_n = np.zeros(N, np.int32)     # node count of the node's graph
    for gid in np.unique(batch):
        idx = np.nonzero(batch == gid)[0]
        n = int(idx.size)
        if n == 0:
            continue
        emask = np.isin(edge_index[0], idx) & np.isin(edge_index[1], idx)
        sub = edge_index[:, emask]
        remap = -np.ones(N, dtype=np.int64)
        remap[idx] = np.arange(n)
        src = remap[sub[0]].astype(np.int32)
        dst = remap[sub[1]].astype(np.int32)
        ci = len(graphs)
        graphs.append((n, src, dst))
        node_gid[idx] = ci
        node_loc[idx] = np.arange(n)
        node_n[idx] = n

    if not graphs:
        return jnp.zeros((N, k), jnp.float32)

    n_counts = np.array([n for n, _, _ in graphs], np.int32)
    n_max = int(n_counts.max())
    num_g = len(graphs)

    l_all = build_laplacians_pallas([(s, d) for _, s, d in graphs],
                                    n_counts, n_max)

    # TODO(synk): torch.linalg.eigh has no Pallas equivalent; one batched
    # jnp.linalg.eigh over all (block-diagonal, padding pushed to _PAD_DIAG)
    # Laplacians replaces the per-graph host eigh loop.  Eigenvector sign /
    # degenerate ordering is arbitrary, as in the PyTorch reference.
    lap = l_all[:num_g, :n_max, :n_max]
    _, vecs = jnp.linalg.eigh(lap)                    # ascending eigenvalues
    k_take = min(k, n_max)
    vecs_k = vecs[:, :, :k_take]
    if k_take < k:
        vecs_k = jnp.pad(vecs_k, ((0, 0), (0, 0), (0, k - k_take)))

    # Per-node gather of its graph's eigenvectors; columns >= n are zeroed
    # (matches the reference's zero padding when n < k).
    gathered = vecs_k[jnp.asarray(node_gid), jnp.asarray(node_loc), :]  # [N,k]
    col = jnp.arange(k, dtype=jnp.int32)[None, :]
    valid = col < jnp.asarray(node_n)[:, None]
    return jnp.where(valid, gathered, 0.0).astype(jnp.float32)


def _laplacian_reference_np(src, dst, n):
    a = np.zeros((n, n), np.float32)
    np.add.at(a, (np.asarray(src), np.asarray(dst)), 1.0)
    deg = np.bincount(np.asarray(src), minlength=n).astype(np.float32) + 1e-6
    dinv = deg ** -0.5
    return np.eye(n, dtype=np.float32) - dinv[:, None] * a * dinv[None, :]


if __name__ == "__main__":
    key = jax.random.PRNGKey(0)

    # --- direct kernel check against numpy (path graph, n=4) ----------------
    path_src = np.array([0, 1, 1, 2, 2, 3], np.int32)
    path_dst = np.array([1, 0, 2, 1, 3, 2], np.int32)
    n_path = 4
    l = build_laplacians_pallas([(path_src, path_dst)],
                                np.array([n_path], np.int32), n_path)
    l = np.asarray(jax.block_until_ready(l))
    l_ref = _laplacian_reference_np(path_src, path_dst, n_path)
    assert np.allclose(l[0, :n_path, :n_path], l_ref, atol=1e-4), \
        float(np.abs(l[0, :n_path, :n_path] - l_ref).max())
    assert np.all(np.diag(l[0])[n_path:] > 1e3)     # padded modes pushed up

    # --- full module: two small graphs (7 and 5 nodes), k = 4 ---------------
    sizes = [7, 5]
    k_dim = 4
    batch = np.concatenate(
        [np.full(s, g, dtype=np.int64) for g, s in enumerate(sizes)])
    N = int(batch.shape[0])

    edge_blocks = []
    offset = 0
    for s in sizes:
        key, sub = jax.random.split(key)
        e = np.asarray(jax.random.randint(sub, (2, 3 * s), 0, s))
        e = np.concatenate([e, e[::-1]], axis=1)    # symmetrize (both directions)
        edge_blocks.append(e + offset)
        offset += s
    edge_index = np.concatenate(edge_blocks, axis=1)   # [2, E] global node ids

    pos = laplacian_positional_encoding(edge_index, batch, N, k_dim)
    pos = np.asarray(jax.block_until_ready(pos))
    assert pos.shape == (N, k_dim) and pos.dtype == np.float32
    assert np.all(np.isfinite(pos))
    # Each of the first min(k, n) columns of a graph's block must be a
    # unit-norm eigenvector supported on that graph's nodes.
    off = 0
    for n in sizes:
        norms = np.linalg.norm(pos[off:off + n, :min(k_dim, n)], axis=0)
        assert np.allclose(norms, 1.0, atol=1e-3), norms
        off += n
    print("KERNEL_OK")
</pallas_src>

<mosaic_0001>
module attributes {stable_mosaic.version = 11 : i64} {
  func.func @_laplacian_kernel(%arg0: i32, %arg1: memref<1xi32, #tpu.memory_space<smem>>, %arg2: memref<1x2x128xi32, #tpu.memory_space<vmem>>, %arg3: memref<1x128x128xf32, #tpu.memory_space<vmem>>) attributes {dimension_semantics = [#tpu.dimension_semantics<parallel>], iteration_bounds = array<i64: 1>, scalar_prefetch = 1 : i64, scratch_operands = 0 : i64, tpu.core_type = #tpu.core_type<tc>, window_params = [{transform_indices = @transform_0, window_bounds = array<i64: 1, 2, 128>}, {transform_indices = @transform_1, window_bounds = array<i64: 1, 128, 128>}]} {
    %0 = tpu.iota {dimensions = array<i32: 0>} : vector<128x128xi32>
    %1 = tpu.iota {dimensions = array<i32: 0>} : vector<128x128xi32>
    %2 = tpu.iota {dimensions = array<i32: 1>} : vector<128x128xi32>
    %3 = arith.cmpi eq, %1, %2 : vector<128x128xi32>
    %cst = arith.constant 1.000000e+00 : bf16
    %4 = vector.broadcast %cst : bf16 to vector<128x1xbf16>
    %cst_0 = arith.constant 1.000000e+00 : bf16
    %5 = vector.broadcast %cst_0 : bf16 to vector<1x128xbf16>
    %c0 = arith.constant 0 : index
    %c0_1 = arith.constant 0 : index
    %c0_2 = arith.constant 0 : index
    %6 = vector.load %arg2[%c0, %c0_1, %c0_2] : memref<1x2x128xi32, #tpu.memory_space<vmem>>, vector<1x2x128xi32>
    %7 = vector.shape_cast %6 : vector<1x2x128xi32> to vector<2x128xi32>
    %8 = vector.extract_strided_slice %7 {offsets = [0, 0], sizes = [1, 128], strides = [1, 1]} : vector<2x128xi32> to vector<1x128xi32>
    %9 = vector.extract_strided_slice %7 {offsets = [1, 0], sizes = [1, 128], strides = [1, 1]} : vector<2x128xi32> to vector<1x128xi32>
    %10 = vector.broadcast %8 : vector<1x128xi32> to vector<128x128xi32>
    %11 = arith.cmpi eq, %0, %10 : vector<128x128xi32>
    %12 = arith.extui %11 : vector<128x128xi1> to vector<128x128xi32>
    %13 = arith.sitofp %12 : vector<128x128xi32> to vector<128x128xf32>
    %14 = arith.truncf %13 : vector<128x128xf32> to vector<128x128xbf16>
    %15 = vector.broadcast %9 : vector<1x128xi32> to vector<128x128xi32>
    %16 = arith.cmpi eq, %0, %15 : vector<128x128xi32>
    %17 = arith.extui %16 : vector<128x128xi1> to vector<128x128xi32>
    %18 = arith.sitofp %17 : vector<128x128xi32> to vector<128x128xf32>
    %19 = arith.truncf %18 : vector<128x128xf32> to vector<128x128xbf16>
    %cst_3 = arith.constant dense<0.000000e+00> : vector<128x128xf32>
    %20 = tpu.matmul %14, %19, %cst_3 {dimension_numbers = #tpu.dot_dimension_numbers<[1], [1], [0], [0], [0, 0, 1, 0], [], []>} : vector<128x128xbf16>, vector<128x128xbf16>, vector<128x128xf32> -> vector<128x128xf32>
    %cst_4 = arith.constant dense<0.000000e+00> : vector<128x1xf32>
    %21 = tpu.matmul %14, %4, %cst_4 {dimension_numbers = #tpu.dot_dimension_numbers<[1], [0], [0], [1], [0, 0, 1, 1], [], []>} : vector<128x128xbf16>, vector<128x1xbf16>, vector<128x1xf32> -> vector<128x1xf32>
    %cst_5 = arith.constant dense<0.000000e+00> : vector<1x128xf32>
    %22 = tpu.matmul %5, %14, %cst_5 {dimension_numbers = #tpu.dot_dimension_numbers<[1], [1], [0], [0], [0, 0, 1, 0], [], []>} : vector<1x128xbf16>, vector<128x128xbf16>, vector<1x128xf32> -> vector<1x128xf32>
    %cst_6 = arith.constant 9.99999997E-7 : f32
    %23 = vector.broadcast %cst_6 : f32 to vector<128x1xf32>
    %24 = arith.addf %21, %23 : vector<128x1xf32>
    %25 = math.rsqrt %24 : vector<128x1xf32>
    %cst_7 = arith.constant 9.99999997E-7 : f32
    %26 = vector.broadcast %cst_7 : f32 to vector<1x128xf32>
    %27 = arith.addf %22, %26 : vector<1x128xf32>
    %28 = math.rsqrt %27 : vector<1x128xf32>
    %c1_i32 = arith.constant 1 : i32
    %29 = arith.muli %arg0, %c1_i32 : i32
    %c0_i32 = arith.constant 0 : i32
    %30 = arith.addi %29, %c0_i32 : i32
    %31 = arith.index_cast %30 : i32 to index
    %32 = memref.load %arg1[%31] : memref<1xi32, #tpu.memory_space<smem>>
    %33 = vector.broadcast %32 : i32 to vector<128x128xi32>
    %34 = arith.cmpi sge, %1, %33 : vector<128x128xi32>
    %cst_8 = arith.constant 1.000000e+04 : f32
    %cst_9 = arith.constant 1.000000e+00 : f32
    %35 = vector.broadcast %cst_8 : f32 to vector<128x128xf32>
    %36 = vector.broadcast %cst_9 : f32 to vector<128x128xf32>
    %37 = arith.select %34, %35, %36 : vector<128x128xi1>, vector<128x128xf32>
    %cst_10 = arith.constant 0.000000e+00 : f32
    %38 = vector.broadcast %cst_10 : f32 to vector<128x128xf32>
    %39 = arith.select %3, %37, %38 : vector<128x128xi1>, vector<128x128xf32>
    %40 = vector.broadcast %25 : vector<128x1xf32> to vector<128x128xf32>
    %41 = arith.mulf %40, %20 : vector<128x128xf32>
    %42 = vector.broadcast %28 : vector<1x128xf32> to vector<128x128xf32>
    %43 = arith.mulf %41, %42 : vector<128x128xf32>
    %44 = arith.subf %39, %43 : vector<128x128xf32>
    %c0_11 = arith.constant 0 : index
    %c0_12 = arith.constant 0 : index
    %c0_13 = arith.constant 0 : index
    %45 = vector.load %arg3[%c0_11, %c0_12, %c0_13] : memref<1x128x128xf32, #tpu.memory_space<vmem>>, vector<1x128x128xf32>
    %46 = vector.shape_cast %45 : vector<1x128x128xf32> to vector<128x128xf32>
    %47 = vector.shape_cast %44 : vector<128x128xf32> to vector<1x128x128xf32>
    tpu.vector_store %arg3[%c0_11, %c0_12, %c0_13], %47 {strides = array<i32>} : memref<1x128x128xf32, #tpu.memory_space<vmem>>, vector<1x128x128xf32>,
    return
  }
  func.func @transform_0(%arg0: i32, %arg1: memref<1xi32, #tpu.memory_space<smem>>) -> (i32, i32, i32) {
    %c0_i32 = arith.constant 0 : i32
    %c0_i32_0 = arith.constant 0 : i32
    %c0_i32_1 = arith.constant 0 : i32
    return %arg0, %c0_i32, %c0_i32_0 : i32, i32, i32
  }
  func.func @transform_1(%arg0: i32, %arg1: memref<1xi32, #tpu.memory_space<smem>>) -> (i32, i32, i32) {
    %c0_i32 = arith.constant 0 : i32
    %c0_i32_0 = arith.constant 0 : i32
    %c0_i32_1 = arith.constant 0 : i32
    return %arg0, %c0_i32, %c0_i32_0 : i32, i32, i32
  }
}

</mosaic_0001>

<bundles_post_ra>
// kernel: tpu_custom_call.1
= control target key start
LH: loop header
LB: loop body
LE: loop exit
PB: predicated region body
PF: predicated region fallthrough
CT: control target
= control target key end

     0   :  { %v830_v0 = vmov 1065369472   ;;  %s1221_s0 = inlined_call_operand.<no memory space> [shape: s32[1], index: 0, kind: input, shape index: {}]   ;;  %s1222_s1 = inlined_call_operand.vmem [shape: s32[1,2,128], index: 1, kind: input, shape index: {}]   ;;  %s1223_s2 = inlined_call_operand.hbm [shape: f32[1,128,128], index: 2, kind: output, shape index: {}]  }
   0x1   :  { %211 = vmatpush.bf16.msra.mxu1 %v830_v0 }
   0x2   :  { %8 = vsyncpa [#allocation5], 0  ;;  %v12_v1 = vlaneseq  ;;  %v47_v3 = vld [vmem:[%s1222_s1] sm:$0x3]  ;;  %v831_v7 = vmov 1.0|1.0  }
   0x3   :  { %v867_v5 = vperm.slane %v47_v3, 0  ;;  %v888_v10 = vperm.slane %v47_v3, 1  ;;  %v832_v30 = vmov 0   ;;  %s644_s15 = sshll.u32 %s1223_s2, 4  ;;  %s835_s16 = smov 128   ;;  %s645_s15 = int_to_ptr.hbm [resolvable:$true] %s644_s15 }
   0x4   :  { %v858_v2 = vshrl.u32 %v12_v1, 7  ;;  %767 = vset.pattern.permute.xlu0 %v832_v30  ;;  %768 = vset.pattern.permute.xlu1 %v832_v30  ;;  %s836_s17 = smov 8  }
   0x5   :  { %212 = vmatpush.bf16.msra.mxu1 %v830_v0  ;;  %769 = vset.pattern.permute.xlu2 %v832_v30 }
   0x6   :  { %v865_v4 = vadd.s32 8, %v858_v2  ;;  %vm49_vm0 = vcmp.eq.s32.totalorder %v858_v2, %v867_v5  ;;  %v883_v8 = vadd.s32 112, %v858_v2  ;;  %v886_v9 = vadd.s32 120, %v858_v2 }
   0x7   :  { %v908_v12 = vadd.s32 16, %v858_v2  ;;  %v911_v13 = vadd.s32 24, %v858_v2  ;;  %v925_v15 = vadd.s32 96, %v858_v2  ;;  %v928_v16 = vadd.s32 104, %v858_v2 }
   0x8   :  { %vm50_vm1 = vcmp.eq.s32.totalorder %v865_v4, %v867_v5  ;;  %vm63_vm3 = vcmp.eq.s32.totalorder %v883_v8, %v867_v5  ;;  %vm64_vm4 = vcmp.eq.s32.totalorder %v886_v9, %v867_v5  ;;  %vm120_vm5 = vcmp.eq.s32.totalorder %v883_v8, %v888_v10 }
   0x9   :  { %213 = vmatpush.bf16.msra.mxu1 %v830_v0  ;;  %vm875_vm2 = vmpackc.low %vm50_vm1, %vm49_vm0  ;;  %vm121_vm6 = vcmp.eq.s32.totalorder %v886_v9, %v888_v10  ;;  %vm51_vm9 = vcmp.eq.s32.totalorder %v908_v12, %v867_v5  ;;  %vm52_vm10 = vcmp.eq.s32.totalorder %v911_v13, %v867_v5  ;;  %v931_v17 = vadd.s32 80, %v858_v2 }
   0xa   :  { %vm898_vm7 = vmpackc.low %vm64_vm4, %vm63_vm3  ;;  %v934_v18 = vadd.s32 88, %v858_v2  ;;  %vm61_vm12 = vcmp.eq.s32.totalorder %v925_v15, %v867_v5  ;;  %vm62_vm13 = vcmp.eq.s32.totalorder %v928_v16, %v867_v5  ;;  %vm118_vm14 = vcmp.eq.s32.totalorder %v925_v15, %v888_v10 }
   0xb   :  { %737 = vmatpush.bf16.xpose.msk.msra.mxu2 %vm898_vm7, %v831_v7  ;;  %vm688_vm8 = vmpackc.low %vm121_vm6, %vm120_vm5  ;;  %vm119_vm15 = vcmp.eq.s32.totalorder %v928_v16, %v888_v10  ;;  %v954_v20 = vadd.s32 32, %v858_v2  ;;  %v957_v21 = vadd.s32 40, %v858_v2  ;;  %vm59_vm3 = vcmp.eq.s32.totalorder %v931_v17, %v867_v5 }
   0xc   :  { %689 = vmatpush.bf16.xpose.msk.msra.mxu0 %vm688_vm8, %v831_v7  ;;  %752 = vmatpush.bf16.xpose.msk.msra.mxu3 %vm688_vm8, %v831_v7  ;;  %vm917_vm11 = vmpackc.low %vm52_vm10, %vm51_vm9  ;;  %vm60_vm4 = vcmp.eq.s32.totalorder %v934_v18, %v867_v5  ;;  %vm116_vm5 = vcmp.eq.s32.totalorder %v931_v17, %v888_v10  ;;  %vm117_vm6 = vcmp.eq.s32.totalorder %v934_v18, %v888_v10  ;;  %v979_v23 = vadd.s32 64, %v858_v2 }
   0xd   :  { %214 = vmatpush.bf16.msra.mxu1 %v830_v0  ;;  %vm944_vm0 = vmpackc.low %vm62_vm13, %vm61_vm12  ;;  %vm53_vm9 = vcmp.eq.s32.totalorder %v954_v20, %v867_v5  ;;  %vm54_vm10 = vcmp.eq.s32.totalorder %v957_v21, %v867_v5  ;;  %v982_v24 = vadd.s32 72, %v858_v2  ;;  %v1006_v27 = vadd.s32 48, %v858_v2 }
   0xe   :  { %vm690_vm1 = vmpackc.low %vm119_vm15, %vm118_vm14  ;;  %vm57_vm14 = vcmp.eq.s32.totalorder %v979_v23, %v867_v5  ;;  %v1009_v28 = vadd.s32 56, %v858_v2 }
   0xf   :  { %vm967_vm8 = vmpackc.low %vm60_vm4, %vm59_vm3  ;;  %vm58_vm15 = vcmp.eq.s32.totalorder %v982_v24, %v867_v5  ;;  %vm115_vm3 = vcmp.eq.s32.totalorder %v982_v24, %v888_v10 }
  0x10   :  { %vm692_vm12 = vmpackc.low %vm117_vm6, %vm116_vm5  ;;  %vm112_vm6 = vcmp.eq.s32.totalorder %v1006_v27, %v888_v10 }
  0x11   :  { %215 = vmatpush.bf16.msra.mxu1 %v830_v0  ;;  %vm984_vm13 = vmpackc.low %vm54_vm10, %vm53_vm9  ;;  %vm113_vm9 = vcmp.eq.s32.totalorder %v1009_v28, %v888_v10  ;;  %vm55_vm10 = vcmp.eq.s32.totalorder %v1006_v27, %v867_v5 }
  0x12   :  { %vm1001_vm5 = vmpackc.low %vm58_vm15, %vm57_vm14 }
  0x13   :  { %739 = vmatpush.bf16.xpose.msk.msra.mxu2 %vm944_vm0, %v831_v7  ;;  %vm696_vm14 = vmpackc.low %vm113_vm9, %vm112_vm6  ;;  %vm108_vm6 = vcmp.eq.s32.totalorder %v908_v12, %v888_v10  ;;  %vm109_vm9 = vcmp.eq.s32.totalorder %v911_v13, %v888_v10 }
  0x14   :  { %691 = vmatpush.bf16.xpose.msk.msra.mxu0 %vm690_vm1, %v831_v7  ;;  %753 = vmatpush.bf16.xpose.msk.msra.mxu3 %vm690_vm1, %v831_v7  ;;  %vm114_vm1 = vcmp.eq.s32.totalorder %v979_v23, %v888_v10 }
  0x15   :  { %216 = vmatpush.bf16.msra.mxu1 %v830_v0  ;;  %vm694_vm4 = vmpackc.low %vm115_vm3, %vm114_vm1  ;;  %vm110_vm1 = vcmp.eq.s32.totalorder %v954_v20, %v888_v10  ;;  %vm111_vm3 = vcmp.eq.s32.totalorder %v957_v21, %v888_v10 }
  0x19   :  { %217 = vmatpush.bf16.msra.mxu1 %v830_v0 }
  0x1b   :  { %741 = vmatpush.bf16.xpose.msk.msra.mxu2 %vm967_vm8, %v831_v7 }
  0x1c   :  { %693 = vmatpush.bf16.xpose.msk.msra.mxu0 %vm692_vm12, %v831_v7  ;;  %754 = vmatpush.bf16.xpose.msk.msra.mxu3 %vm692_vm12, %v831_v7  ;;  %vm56_vm12 = vcmp.eq.s32.totalorder %v1009_v28, %v867_v5 }
  0x1d   :  { %218 = vmatpush.bf16.msra.mxu1 %v830_v0  ;;  %vm1024_vm15 = vmpackc.low %vm56_vm12, %vm55_vm10  ;;  %vm106_vm12 = vcmp.eq.s32.totalorder %v858_v2, %v888_v10 }
  0x1e   :  { %vm700_vm10 = vmpackc.low %vm109_vm9, %vm108_vm6 }
  0x20   :  { %721 = vmatmul.msk.bf16.vlgmr.msra.gmra.mxu1 %vm875_vm2, %v831_v7 }
  0x23   :  { %743 = vmatpush.bf16.xpose.msk.msra.mxu2 %vm1001_vm5, %v831_v7 }
  0x24   :  { %695 = vmatpush.bf16.xpose.msk.msra.mxu0 %vm694_vm4, %v831_v7  ;;  %755 = vmatpush.bf16.xpose.msk.msra.mxu3 %vm694_vm4, %v831_v7  ;;  %vm698_vm4 = vmpackc.low %vm111_vm3, %vm110_vm1 }
  0x2b   :  { %745 = vmatpush.bf16.xpose.msk.msra.mxu2 %vm1024_vm15, %v831_v7 }
  0x2c   :  { %697 = vmatpush.bf16.xpose.msk.msra.mxu0 %vm696_vm14, %v831_v7  ;;  %756 = vmatpush.bf16.xpose.msk.msra.mxu3 %vm696_vm14, %v831_v7  ;;  %vm107_vm14 = vcmp.eq.s32.totalorder %v865_v4, %v888_v10 }
  0x2d   :  { %vm702_vm1 = vmpackc.low %vm107_vm14, %vm106_vm12 }
  0x30   :  { %723 = vmatmul.msk.bf16.gmra.mxu1 %vm917_vm11, %v831_v7 }
  0x33   :  { %747 = vmatpush.bf16.xpose.msk.msra.mxu2 %vm984_vm13, %v831_v7 }
  0x34   :  { %699 = vmatpush.bf16.xpose.msk.msra.mxu0 %vm698_vm4, %v831_v7  ;;  %757 = vmatpush.bf16.xpose.msk.msra.mxu3 %vm698_vm4, %v831_v7 }
  0x3b   :  { %749 = vmatpush.bf16.xpose.msk.msra.mxu2 %vm917_vm11, %v831_v7 }
  0x3c   :  { %701 = vmatpush.bf16.xpose.msk.msra.mxu0 %vm700_vm10, %v831_v7  ;;  %758 = vmatpush.bf16.xpose.msk.msra.mxu3 %vm700_vm10, %v831_v7 }
  0x40   :  { %725 = vmatmul.msk.bf16.gmra.mxu1 %vm984_vm13, %v831_v7 }
  0x43   :  { %751 = vmatpush.bf16.xpose.msk.msra.mxu2 %vm875_vm2, %v831_v7 }
  0x44   :  { %703 = vmatpush.bf16.xpose.msk.msra.mxu0 %vm702_vm1, %v831_v7  ;;  %759 = vmatpush.bf16.xpose.msk.msra.mxu3 %vm702_vm1, %v831_v7 }
  0x4a   :  { %428 = vmatmul.bf16.vlgmr.msra.gmra.mxu2 %v830_v0 }
  0x4b   :  { %705 = vmatmul.msk.bf16.vlgmr.msra.gmra.mxu0 %vm875_vm2, %v831_v7  ;;  %713 = vmatmul.msk.bf16.vlgmr.msra.gmra.mxu3 %vm1001_vm5, %v831_v7 }
  0x50   :  { %727 = vmatmul.msk.bf16.gmra.mxu1 %vm1024_vm15, %v831_v7 }
  0x5b   :  { %707 = vmatmul.msk.bf16.gmra.mxu0 %vm917_vm11, %v831_v7  ;;  %715 = vmatmul.msk.bf16.gmra.mxu3 %vm967_vm8, %v831_v7 }
  0x60   :  { %729 = vmatmul.msk.bf16.gmra.mxu1 %vm1001_vm5, %v831_v7 }
  0x6b   :  { %709 = vmatmul.msk.bf16.gmra.mxu0 %vm984_vm13, %v831_v7  ;;  %717 = vmatmul.msk.bf16.gmra.mxu3 %vm944_vm0, %v831_v7 }
  0x70   :  { %731 = vmatmul.msk.bf16.gmra.mxu1 %vm967_vm8, %v831_v7 }
  0x7b   :  { %711 = vmatmul.msk.bf16.gmra.mxu0 %vm1024_vm15, %v831_v7  ;;  %719 = vmatmul.msk.bf16.gmra.mxu3 %vm898_vm7, %v831_v7 }
  0x80   :  { %733 = vmatmul.msk.bf16.gmra.mxu1 %vm944_vm0, %v831_v7 }
  0x90   :  { %735 = vmatmul.msk.bf16.gmra.mxu1 %vm898_vm7, %v831_v7 }
  0x9d   :  { %v220_v31 = vpop.f32.mrf.mxu1 }
  0x9e   :  { %v221_v32 = vadd.f32 1e-06, %v220_v31 }
  0xa0   :  { %770 = vrsqrt.f32 %v221_v32  ;;  %vm266_vm11 = vweird.f32 %v221_v32 }
  0xa5   :  { %v222_v33 = vpop.f32.mrf.mxu1 }
  0xa6   :  { %v771_v34 = vpop.eup %770  ;;  %v223_v35 = vadd.f32 1e-06, %v222_v33 }
  0xa7   :  { %v261_v36 = vmul.f32 %v771_v34, %v221_v32  ;;  %vm267_vm2 = vweird.f32 %v771_v34 }
  0xa8   :  { %772 = vrsqrt.f32 %v223_v35  ;;  %vm268_vm7 = vmor %vm266_vm11, %vm267_vm2  ;;  %vm276_vm8 = vweird.f32 %v223_v35 }
  0xa9   :  { %v262_v37 = vmul.f32 %v771_v34, %v261_v36 }
  0xab   :  { %v263_v38 = vmul.f32 0.5, %v262_v37 }
  0xad   :  { %v225_v39 = vpop.f32.mrf.mxu1  ;;  %v264_v40 = vsub.f32 1.5, %v263_v38 }
  0xae   :  { %v773_v41 = vpop.eup %772  ;;  %v226_v42 = vadd.f32 1e-06, %v225_v39 }
  0xaf   :  { %v271_v43 = vmul.f32 %v773_v41, %v223_v35  ;;  %v265_v44 = vmul.f32 %v771_v34, %v264_v40  ;;  %vm277_vm0 = vweird.f32 %v773_v41 }
  0xb0   :  { %774 = vrsqrt.f32 %v226_v42  ;;  %vm278_vm13 = vmor %vm276_vm8, %vm277_vm0  ;;  %vm286_vm15 = vweird.f32 %v226_v42 }
  0xb1   :  { %v272_v45 = vmul.f32 %v773_v41, %v271_v43  ;;  %v269_v46 = vsel %vm268_vm7, %v771_v34, %v265_v44 }
  0xb2   :  { %495 = vperm.xlu0 %767, %v269_v46  }
  0xb3   :  { %v273_v47 = vmul.f32 0.5, %v272_v45 }
  0xb5   :  { %v274_v48 = vsub.f32 1.5, %v273_v47  ;;  %v227_v49 = vpop.f32.mrf.mxu1 }
  0xb6   :  { %v775_v50 = vpop.eup %774  ;;  %v228_v51 = vadd.f32 1e-06, %v227_v49 }
  0xb7   :  { %v281_v52 = vmul.f32 %v775_v50, %v226_v42  ;;  %v275_v53 = vmul.f32 %v773_v41, %v274_v48  ;;  %vm287_vm5 = vweird.f32 %v775_v50 }
  0xb8   :  { %776 = vrsqrt.f32 %v228_v51  ;;  %vm288_vm3 = vmor %vm286_vm15, %vm287_vm5  ;;  %vm296_vm6 = vweird.f32 %v228_v51 }
  0xb9   :  { %v282_v54 = vmul.f32 %v775_v50, %v281_v52  ;;  %v279_v55 = vsel %vm278_vm13, %v773_v41, %v275_v53 }
  0xba   :  { %500 = vperm.xlu0 %767, %v279_v55  }
  0xbb   :  { %v283_v56 = vmul.f32 0.5, %v282_v54 }
  0xbd   :  { %v230_v57 = vpop.f32.mrf.mxu1  ;;  %v284_v58 = vsub.f32 1.5, %v283_v56 }
  0xbe   :  { %v777_v59 = vpop.eup %776  ;;  %v231_v60 = vadd.f32 1e-06, %v230_v57 }
  0xbf   :  { %v291_v61 = vmul.f32 %v777_v59, %v228_v51  ;;  %v285_v62 = vmul.f32 %v775_v50, %v284_v58  ;;  %vm297_vm4 = vweird.f32 %v777_v59 }
  0xc0   :  { %778 = vrsqrt.f32 %v231_v60  ;;  %vm298_vm9 = vmor %vm296_vm6, %vm297_vm4  ;;  %vm306_vm12 = vweird.f32 %v231_v60 }
  0xc1   :  { %v292_v63 = vmul.f32 %v777_v59, %v291_v61  ;;  %v289_v0 = vsel %vm288_vm3, %v775_v50, %v285_v62 }
  0xc2   :  { %505 = vperm.xlu1 %768, %v289_v0  }
  0xc3   :  { %v293_v3 = vmul.f32 0.5, %v292_v63 }
  0xc5   :  { %v294_v5 = vsub.f32 1.5, %v293_v3  ;;  %v232_v6 = vpop.f32.mrf.mxu1 }
  0xc6   :  { %v779_v7 = vpop.eup %778  ;;  %v233_v10 = vadd.f32 1e-06, %v232_v6 }
  0xc7   :  { %v301_v11 = vmul.f32 %v779_v7, %v231_v60  ;;  %v295_v14 = vmul.f32 %v777_v59, %v294_v5  ;;  %vm307_vm10 = vweird.f32 %v779_v7 }
  0xc8   :  { %780 = vrsqrt.f32 %v233_v10  ;;  %vm308_vm14 = vmor %vm306_vm12, %vm307_vm10  ;;  %vm316_vm2 = vweird.f32 %v233_v10 }
  0xc9   :  { %v302_v19 = vmul.f32 %v779_v7, %v301_v11  ;;  %v299_v22 = vsel %vm298_vm9, %v777_v59, %v295_v14 }
  0xca   :  { %510 = vperm.xlu1 %768, %v299_v22  }
  0xcb   :  { %v303_v25 = vmul.f32 0.5, %v302_v19 }
  0xcd   :  { %v235_v26 = vpop.f32.mrf.mxu1  ;;  %v304_v29 = vsub.f32 1.5, %v303_v25  ;;  %v429_v11 = vpop.f32.mrf.mxu2 }
  0xce   :  { %v781_v30 = vpop.eup %780  ;;  %v236_v31 = vadd.f32 1e-06, %v235_v26 }
  0xcf   :  { %v311_v32 = vmul.f32 %v781_v30, %v233_v10  ;;  %v305_v33 = vmul.f32 %v779_v7, %v304_v29  ;;  %vm317_vm1 = vweird.f32 %v781_v30 }
  0xd0   :  { %782 = vrsqrt.f32 %v236_v31  ;;  %vm318_vm11 = vmor %vm316_vm2, %vm317_vm1  ;;  %vm326_vm0 = vweird.f32 %v236_v31 }
  0xd1   :  { %v312_v34 = vmul.f32 %v781_v30, %v311_v32  ;;  %v309_v35 = vsel %vm308_vm14, %v779_v7, %v305_v33 }
  0xd2   :  { %515 = vperm.xlu2 %769, %v309_v35  }
  0xd3   :  { %v313_v36 = vmul.f32 0.5, %v312_v34 }
  0xd5   :  { %v314_v37 = vsub.f32 1.5, %v313_v36  ;;  %v237_v38 = vpop.f32.mrf.mxu1  ;;  %v431_v33 = vpop.f32.mrf.mxu2 }
  0xd6   :  { %v783_v39 = vpop.eup %782  ;;  %v238_v40 = vadd.f32 1e-06, %v237_v38 }
  0xd7   :  { %v321_v41 = vmul.f32 %v783_v39, %v236_v31  ;;  %v315_v42 = vmul.f32 %v781_v30, %v314_v37  ;;  %vm327_vm7 = vweird.f32 %v783_v39 }
  0xd8   :  { %784 = vrsqrt.f32 %v238_v40  ;;  %vm328_vm8 = vmor %vm326_vm0, %vm327_vm7  ;;  %vm336_vm5 = vweird.f32 %v238_v40 }
  0xd9   :  { %v322_v43 = vmul.f32 %v783_v39, %v321_v41  ;;  %v319_v44 = vsel %vm318_vm11, %v781_v30, %v315_v42 }
  0xda   :  { %520 = vperm.xlu2 %769, %v319_v44   ;;  %v1100_v44 = vpop.f32.mrf.mxu0 }
  0xdb   :  { %v323_v45 = vmul.f32 0.5, %v322_v43  ;;  %v430_v43 = vadd.f32 1e-06, %v429_v11 }
  0xdd   :  { %v324_v46 = vsub.f32 1.5, %v323_v45  ;;  %v240_v47 = vpop.f32.mrf.mxu1 }
  0xde   :  { %v785_v48 = vpop.eup %784  ;;  %v241_v49 = vadd.f32 1e-06, %v240_v47 }
  0xdf   :  { %v331_v50 = vmul.f32 %v785_v48, %v238_v40  ;;  %v325_v51 = vmul.f32 %v783_v39, %v324_v46  ;;  %vm337_vm13 = vweird.f32 %v785_v48 }
  0xe0   :  { %786 = vrsqrt.f32 %v241_v49  ;;  %vm338_vm15 = vmor %vm336_vm5, %vm337_vm13  ;;  %vm346_vm4 = vweird.f32 %v241_v49 }
  0xe1   :  { %v332_v52 = vmul.f32 %v785_v48, %v331_v50  ;;  %v329_v53 = vsel %vm328_vm8, %v783_v39, %v325_v51 }
  0xe2   :  { %525 = vperm.xlu0 %767, %v329_v53  }
  0xe3   :  { %v333_v54 = vmul.f32 0.5, %v332_v52 }
  0xe5   :  { %v334_v55 = vsub.f32 1.5, %v333_v54  ;;  %v242_v56 = vpop.f32.mrf.mxu1 }
  0xe6   :  { %v787_v57 = vpop.eup %786  ;;  %v243_v58 = vadd.f32 1e-06, %v242_v56 }
  0xe7   :  { %v341_v59 = vmul.f32 %v787_v57, %v241_v49  ;;  %v335_v60 = vmul.f32 %v785_v48, %v334_v55  ;;  %vm347_vm3 = vweird.f32 %v787_v57 }
  0xe8   :  { %788 = vrsqrt.f32 %v243_v58  ;;  %vm348_vm6 = vmor %vm346_vm4, %vm347_vm3  ;;  %vm356_vm10 = vweird.f32 %v243_v58 }
  0xe9   :  { %v342_v61 = vmul.f32 %v787_v57, %v341_v59  ;;  %v339_v62 = vsel %vm338_vm15, %v785_v48, %v335_v60 }
  0xea   :  { %530 = vperm.xlu1 %768, %v339_v62  }
  0xeb   :  { %v343_v63 = vmul.f32 0.5, %v342_v61 }
  0xed   :  { %v344_v0 = vsub.f32 1.5, %v343_v63  ;;  %v245_v3 = vpop.f32.mrf.mxu1 }
  0xee   :  { %v789_v5 = vpop.eup %788  ;;  %v246_v6 = vadd.f32 1e-06, %v245_v3 }
  0xef   :  { %v351_v7 = vmul.f32 %v789_v5, %v243_v58  ;;  %v345_v10 = vmul.f32 %v787_v57, %v344_v0  ;;  %vm357_vm9 = vweird.f32 %v789_v5 }
  0xf0   :  { %790 = vrsqrt.f32 %v246_v6  ;;  %vm358_vm12 = vmor %vm356_vm10, %vm357_vm9  ;;  %vm366_vm1 = vweird.f32 %v246_v6 }
  0xf1   :  { %v352_v14 = vmul.f32 %v789_v5, %v351_v7  ;;  %v349_v19 = vsel %vm348_vm6, %v787_v57, %v345_v10  ;;  %v1102_v57 = vpop.f32.mrf.mxu0  ;;  %vm439_vm6 = vweird.f32 %v430_v43 }
  0xf2   :  { %535 = vperm.xlu2 %769, %v349_v19  }
  0xf3   :  { %v353_v22 = vmul.f32 0.5, %v352_v14 }
  0xf5   :  { %v354_v25 = vsub.f32 1.5, %v353_v22  ;;  %v247_v26 = vpop.f32.mrf.mxu1 }
  0xf6   :  { %v791_v29 = vpop.eup %790  ;;  %v248_v30 = vadd.f32 1e-06, %v247_v26 }
  0xf7   :  { %v361_v31 = vmul.f32 %v791_v29, %v246_v6  ;;  %v355_v32 = vmul.f32 %v789_v5, %v354_v25  ;;  %vm367_vm14 = vweird.f32 %v791_v29 }
  0xf8   :  { %792 = vrsqrt.f32 %v248_v30  ;;  %vm368_vm2 = vmor %vm366_vm1, %vm367_vm14  ;;  %vm376_vm7 = vweird.f32 %v248_v30 }
  0xf9   :  { %v362_v34 = vmul.f32 %v791_v29, %v361_v31  ;;  %v359_v35 = vsel %vm358_vm12, %v789_v5, %v355_v32  ;;  %v1104_v14 = vpop.f32.mrf.mxu0 }
  0xfa   :  { %540 = vperm.xlu0 %767, %v359_v35  }
  0xfb   :  { %v363_v36 = vmul.f32 0.5, %v362_v34 }
  0xfd   :  { %v364_v37 = vsub.f32 1.5, %v363_v36  ;;  %v250_v38 = vpop.f32.mrf.mxu1 }
  0xfe   :  { %v793_v39 = vpop.eup %792  ;;  %v251_v40 = vadd.f32 1e-06, %v250_v38 }
  0xff   :  { %v371_v41 = vmul.f32 %v793_v39, %v248_v30  ;;  %v365_v42 = vmul.f32 %v791_v29, %v364_v37  ;;  %vm377_vm11 = vweird.f32 %v793_v39  ;;  %v1109_v37 = vstv %s1221_s0  ;;  %s834_s0 = smov [#allocation4]  }
 0x100   :  { %794 = vrsqrt.f32 %v251_v40  ;;  %vm378_vm0 = vmor %vm376_vm7, %vm377_vm11  ;;  %vm386_vm13 = vweird.f32 %v251_v40  ;;  %s642_s12 = sshll.u32 %s834_s0, 4  ;;  %s643_s12 = int_to_ptr.vmem [resolvable:$true] %s642_s12 }
 0x101   :  { %v372_v45 = vmul.f32 %v793_v39, %v371_v41  ;;  %v369_v46 = vsel %vm368_vm2, %v791_v29, %v365_v42  ;;  %796 = vrsqrt.f32 %v430_v43  ;;  %v1114_v42 = vand.u32 127, %v12_v1 }
 0x102   :  { %545 = vperm.xlu1 %768, %v369_v46   ;;  %vm445_vm2 = vcmp.ge.s32.totalorder %v858_v2, %v1109_v37 }
 0x103   :  { %v373_v47 = vmul.f32 0.5, %v372_v45  ;;  %vm31_vm11 = vcmp.eq.s32.totalorder %v858_v2, %v1114_v42 }
 0x105   :  { %v374_v48 = vsub.f32 1.5, %v373_v47  ;;  %v252_v49 = vpop.f32.mrf.mxu1 }
 0x106   :  { %v795_v50 = vpop.eup %794  ;;  %v253_v51 = vadd.f32 1e-06, %v252_v49  ;;  %v833_v49 = vmov 1.0  }
 0x107   :  { %v381_v52 = vmul.f32 %v795_v50, %v251_v40  ;;  %v375_v53 = vmul.f32 %v793_v39, %v374_v48  ;;  %v797_v54 = vpop.eup %796  ;;  %vm387_vm8 = vweird.f32 %v795_v50 }
 0x108   :  { %798 = vrsqrt.f32 %v253_v51  ;;  %v434_v59 = vmul.f32 %v797_v54, %v430_v43  ;;  %vm388_vm5 = vmor %vm386_vm13, %vm387_vm8  ;;  %vm396_vm3 = vweird.f32 %v253_v51  ;;  %vm440_vm9 = vweird.f32 %v797_v54 }
 0x109   :  { %v382_v55 = vmul.f32 %v795_v50, %v381_v52  ;;  %v379_v56 = vsel %vm378_vm0, %v793_v39, %v375_v53  ;;  %vm441_vm10 = vmor %vm439_vm6, %vm440_vm9  ;;  %v1111_v39 = vpop.f32.mrf.mxu0  ;;  %vm446_vm13 = vcmp.ge.s32.totalorder %v865_v4, %v1109_v37  ;;  %vm450_vm6 = vcmp.ge.s32.totalorder %v957_v21, %v1109_v37 }
 0x10a   :  { %550 = vperm.xlu2 %769, %v379_v56   ;;  %v435_v5 = vmul.f32 %v797_v54, %v434_v59  ;;  %vm33_vm9 = vcmp.eq.s32.totalorder %v908_v12, %v1114_v42 }
 0x10b   :  { %v383_v58 = vmul.f32 0.5, %v382_v55 }
 0x10c   :  { %v436_v11 = vmul.f32 0.5, %v435_v5 }
 0x10d   :  { %v384_v60 = vsub.f32 1.5, %v383_v58  ;;  %v255_v61 = vpop.f32.mrf.mxu1 }
 0x10e   :  { %v799_v62 = vpop.eup %798  ;;  %v256_v63 = vadd.f32 1e-06, %v255_v61  ;;  %v437_v31 = vsub.f32 1.5, %v436_v11 }
 0x10f   :  { %v391_v0 = vmul.f32 %v799_v62, %v253_v51  ;;  %v385_v3 = vmul.f32 %v795_v50, %v384_v60  ;;  %vm397_vm15 = vweird.f32 %v799_v62 }
 0x110   :  { %800 = vrsqrt.f32 %v256_v63  ;;  %vm398_vm4 = vmor %vm396_vm3, %vm397_vm15  ;;  %v438_v35 = vmul.f32 %v797_v54, %v437_v31  ;;  %vm406_vm14 = vweird.f32 %v256_v63  ;;  %vm32_vm15 = vcmp.eq.s32.totalorder %v865_v4, %v1114_v42 }
 0x111   :  { %v392_v6 = vmul.f32 %v799_v62, %v391_v0  ;;  %v389_v7 = vsel %vm388_vm5, %v795_v50, %v385_v3  ;;  %v461_v50 = vsel %vm445_vm2, 10000.0, %v833_v49  ;;  %v181_v56 = vpop.f32.mrf.mxu0  ;;  %vm449_vm5 = vcmp.ge.s32.totalorder %v954_v20, %v1109_v37 }
 0x112   :  { %555 = vperm.xlu0 %767, %v389_v7   ;;  %v442_v43 = vsel %vm441_vm10, %v797_v54, %v438_v35  ;;  %v477_v53 = vsel %vm31_vm11, %v461_v50, 0.0  ;;  %vm35_vm3 = vcmp.eq.s32.totalorder %v954_v20, %v1114_v42  ;;  %v465_v59 = vsel %vm449_vm5, 10000.0, %v833_v49  ;;  %v191_v35 = vpop.f32.mrf.mxu3 }
 0x113   :  { %v393_v10 = vmul.f32 0.5, %v392_v6  ;;  %v1118_v47 = vperm.slane %v442_v43, 0  ;;  %v481_v3 = vsel %vm35_vm3, %v465_v59, 0.0  ;;  %vm36_vm10 = vcmp.eq.s32.totalorder %v957_v21, %v1114_v42 }
 0x114   :  { %vm39_vm2 = vcmp.eq.s32.totalorder %v979_v23, %v1114_v42  ;;  %vm451_vm11 = vcmp.ge.s32.totalorder %v1006_v27, %v1109_v37  ;;  %vm42_vm5 = vcmp.eq.s32.totalorder %v934_v18, %v1114_v42  ;;  %vm40_vm3 = vcmp.eq.s32.totalorder %v982_v24, %v1114_v42 }
 0x115   :  { %v394_v19 = vsub.f32 1.5, %v393_v10  ;;  %v257_v22 = vpop.f32.mrf.mxu1  ;;  %v466_v10 = vsel %vm450_vm6, 10000.0, %v833_v49  ;;  %vm41_vm6 = vcmp.eq.s32.totalorder %v931_v17, %v1114_v42 }
 0x116   :  { %v801_v25 = vpop.eup %800  ;;  %v258_v26 = vadd.f32 1e-06, %v257_v22 }
 0x117   :  { %v401_v29 = vmul.f32 %v801_v25, %v256_v63  ;;  %v395_v30 = vmul.f32 %v799_v62, %v394_v19  ;;  %vm407_vm12 = vweird.f32 %v801_v25 }
 0x118   :  { %802 = vrsqrt.f32 %v258_v26  ;;  %vm408_vm1 = vmor %vm406_vm14, %vm407_vm12  ;;  %vm416_vm0 = vweird.f32 %v258_v26  ;;  %vm448_vm12 = vcmp.ge.s32.totalorder %v911_v13, %v1109_v37  ;;  %vm34_vm14 = vcmp.eq.s32.totalorder %v911_v13, %v1114_v42 }
 0x119   :  { %v402_v32 = vmul.f32 %v801_v25, %v401_v29  ;;  %v399_v33 = vsel %vm398_vm4, %v799_v62, %v395_v30  ;;  %vm447_vm4 = vcmp.ge.s32.totalorder %v908_v12, %v1109_v37  ;;  %v183_v7 = vpop.f32.mrf.mxu0  ;;  %v482_v29 = vsel %vm36_vm10, %v466_v10, 0.0 }
 0x11a   :  { %560 = vperm.xlu1 %768, %v399_v33   ;;  %v464_v21 = vsel %vm448_vm12, 10000.0, %v833_v49  ;;  %vm45_vm10 = vcmp.eq.s32.totalorder %v883_v8, %v1114_v42  ;;  %vm457_vm12 = vcmp.ge.s32.totalorder %v925_v15, %v1109_v37 }
 0x11b   :  { %v403_v34 = vmul.f32 0.5, %v402_v32 }
 0x11d   :  { %v404_v36 = vsub.f32 1.5, %v403_v34  ;;  %v480_v34 = vsel %vm34_vm14, %v464_v21, 0.0  ;;  %vm43_vm14 = vcmp.eq.s32.totalorder %v925_v15, %v1114_v42 }
 0x11e   :  { %v803_v38 = vpop.eup %802 }
 0x11f   :  { %v411_v40 = vmul.f32 %v803_v38, %v258_v26  ;;  %v405_v41 = vmul.f32 %v801_v25, %v404_v36  ;;  %vm417_vm7 = vweird.f32 %v803_v38 }
 0x120   :  { %vm418_vm8 = vmor %vm416_vm0, %vm417_vm7  ;;  %vm37_vm7 = vcmp.eq.s32.totalorder %v1006_v27, %v1114_v42  ;;  %vm452_vm0 = vcmp.ge.s32.totalorder %v1009_v28, %v1109_v37 }
 0x121   :  { %v412_v45 = vmul.f32 %v803_v38, %v411_v40  ;;  %v409_v46 = vsel %vm408_vm1, %v801_v25, %v405_v41  ;;  %vm453_vm1 = vcmp.ge.s32.totalorder %v979_v23, %v1109_v37  ;;  %v193_v40 = vpop.f32.mrf.mxu3 }
 0x122   :  { %565 = vperm.xlu2 %769, %v409_v46   ;;  %v469_v13 = vsel %vm453_vm1, 10000.0, %v833_v49  ;;  %v186_v46 = vpop.f32.mrf.mxu0  ;;  %vm458_vm1 = vcmp.ge.s32.totalorder %v928_v16, %v1109_v37 }
 0x123   :  { %v413_v48 = vmul.f32 0.5, %v412_v45  ;;  %v485_v45 = vsel %vm39_vm2, %v469_v13, 0.0  ;;  %vm44_vm2 = vcmp.eq.s32.totalorder %v928_v16, %v1114_v42 }
 0x124   :  { %v496_v51 = vpop.permute.xlu0 %495 }
 0x125   :  { %v414_v1 = vsub.f32 1.5, %v413_v48  ;;  %v573_v52 = vmul.f32 %v496_v51, %v1100_v44  ;;  %v462_v44 = vsel %vm446_vm13, 10000.0, %v833_v49  ;;  %v467_v51 = vsel %vm451_vm11, 10000.0, %v833_v49 }
 0x126   :  { %v478_v0 = vsel %vm32_vm15, %v462_v44, 0.0  ;;  %vm456_vm13 = vcmp.ge.s32.totalorder %v934_v18, %v1109_v37  ;;  %vm454_vm15 = vcmp.ge.s32.totalorder %v982_v24, %v1109_v37  ;;  %vm460_vm11 = vcmp.ge.s32.totalorder %v886_v9, %v1109_v37 }
 0x127   :  { %v590_v54 = vmul.f32 %v1118_v47, %v573_v52  ;;  %v415_v55 = vmul.f32 %v803_v38, %v414_v1  ;;  %v483_v52 = vsel %vm37_vm7, %v467_v51, 0.0  ;;  %vm46_vm7 = vcmp.eq.s32.totalorder %v886_v9, %v1114_v42 }
 0x129   :  { %v606_v2 = vsub.f32 %v477_v53, %v590_v54  ;;  %v419_v58 = vsel %vm418_vm8, %v803_v38, %v415_v55  ;;  %v196_v50 = vpop.f32.mrf.mxu3  ;;  %vm38_vm8 = vcmp.eq.s32.totalorder %v1009_v28, %v1114_v42 }
 0x12a   :  { %570 = vperm.xlu0 %767, %v419_v58   ;;  %v188_v55 = vpop.f32.mrf.mxu0 }
 0x12b   :  { %622 = vst [vmem:[#allocation4] sm:$0xff] %v606_v2 }
 0x12c   :  { %v516_v60 = vpop.permute.xlu2 %515  ;;  %v501_v61 = vpop.permute.xlu0 %500 }
 0x12d   :  { %v574_v62 = vmul.f32 %v501_v61, %v1102_v57  ;;  %v577_v63 = vmul.f32 %v516_v60, %v181_v56  ;;  %v463_v57 = vsel %vm447_vm4, 10000.0, %v833_v49  ;;  %v468_v56 = vsel %vm452_vm0, 10000.0, %v833_v49 }
 0x12e   :  { %v479_v26 = vsel %vm33_vm9, %v463_v57, 0.0  ;;  %v484_v44 = vsel %vm38_vm8, %v468_v56, 0.0  ;;  %v472_v61 = vsel %vm456_vm13, 10000.0, %v833_v49  ;;  %vm455_vm4 = vcmp.ge.s32.totalorder %v931_v17, %v1109_v37 }
 0x12f   :  { %v591_v5 = vmul.f32 %v1118_v47, %v574_v62  ;;  %v594_v6 = vmul.f32 %v1118_v47, %v577_v63  ;;  %v488_v63 = vsel %vm42_vm5, %v472_v61, 0.0  ;;  %vm459_vm9 = vcmp.ge.s32.totalorder %v883_v8, %v1109_v37 }
 0x131   :  { %v607_v4 = vsub.f32 %v478_v0, %v591_v5  ;;  %v610_v20 = vsub.f32 %v481_v3, %v594_v6  ;;  %v198_v27 = vpop.f32.mrf.mxu3  ;;  %v470_v6 = vsel %vm454_vm15, 10000.0, %v833_v49 }
 0x133   :  { %623 = vst [vmem:[#allocation4 + $0x8] sm:$0xff] %v607_v4 }
 0x134   :  { %626 = vst [vmem:[#allocation4 + $0x20] sm:$0xff] %v610_v20  ;;  %v521_v11 = vpop.permute.xlu2 %520  ;;  %v506_v19 = vpop.permute.xlu1 %505  ;;  %v486_v20 = vsel %vm40_vm3, %v470_v6, 0.0 }
 0x135   :  { %v575_v22 = vmul.f32 %v506_v19, %v1104_v14  ;;  %v578_v25 = vmul.f32 %v521_v11, %v183_v7  ;;  %v471_v11 = vsel %vm455_vm4, 10000.0, %v833_v49 }
 0x137   :  { %v592_v30 = vmul.f32 %v1118_v47, %v575_v22  ;;  %v595_v31 = vmul.f32 %v1118_v47, %v578_v25  ;;  %v487_v22 = vsel %vm41_vm6, %v471_v11, 0.0 }
 0x139   :  { %v608_v12 = vsub.f32 %v479_v26, %v592_v30  ;;  %v611_v32 = vsub.f32 %v482_v29, %v595_v31  ;;  %v201_v0 = vpop.f32.mrf.mxu3  ;;  %v475_v30 = vsel %vm459_vm9, 10000.0, %v833_v49 }
 0x13b   :  { %624 = vst [vmem:[#allocation4 + $0x10] sm:$0xff] %v608_v12  ;;  %v491_v12 = vsel %vm45_vm10, %v475_v30, 0.0 }
 0x13c   :  { %627 = vst [vmem:[#allocation4 + $0x28] sm:$0xff] %v611_v32  ;;  %v511_v14 = vpop.permute.xlu1 %510 }
 0x13d   :  { %v576_v33 = vmul.f32 %v511_v14, %v1111_v39  ;;  %v473_v14 = vsel %vm457_vm12, 10000.0, %v833_v49 }
 0x13e   :  { %v489_v8 = vsel %vm43_vm14, %v473_v14, 0.0 }
 0x13f   :  { %v593_v36 = vmul.f32 %v1118_v47, %v576_v33 }
 0x141   :  { %v609_v38 = vsub.f32 %v480_v34, %v593_v36  ;;  %v203_v57 = vpop.f32.mrf.mxu3 }
 0x143   :  { %625 = vst [vmem:[#allocation4 + $0x18] sm:$0xff] %v609_v38  ;;  %v474_v38 = vsel %vm458_vm1, 10000.0, %v833_v49 }
 0x144   :  { %v490_v15 = vsel %vm44_vm2, %v474_v38, 0.0 }
 0x149   :  { %v206_v29 = vpop.f32.mrf.mxu3 }
 0x14c   :  { %v536_v41 = vpop.permute.xlu2 %535 }
 0x14d   :  { %v581_v43 = vmul.f32 %v536_v41, %v191_v35 }
 0x14f   :  { %v598_v39 = vmul.f32 %v1118_v47, %v581_v43 }
 0x151   :  { %v614_v48 = vsub.f32 %v485_v45, %v598_v39  ;;  %v476_v45 = vsel %vm460_vm11, 10000.0, %v833_v49  ;;  %v208_v39 = vpop.f32.mrf.mxu3 }
 0x153   :  { %630 = vst [vmem:[#allocation4 + $0x40] sm:$0xff] %v614_v48  ;;  %v492_v48 = vsel %vm46_vm7, %v476_v45, 0.0 }
 0x154   :  { %v526_v23 = vpop.permute.xlu0 %525 }
 0x155   :  { %v579_v1 = vmul.f32 %v526_v23, %v186_v46 }
 0x157   :  { %v596_v53 = vmul.f32 %v1118_v47, %v579_v1 }
 0x159   :  { %v612_v54 = vsub.f32 %v483_v52, %v596_v53 }
 0x15b   :  { %628 = vst [vmem:[#allocation4 + $0x30] sm:$0xff] %v612_v54 }
 0x15c   :  { %v531_v2 = vpop.permute.xlu1 %530 }
 0x15d   :  { %v580_v58 = vmul.f32 %v531_v2, %v188_v55 }
 0x15f   :  { %v597_v59 = vmul.f32 %v1118_v47, %v580_v58 }
 0x161   :  { %v613_v60 = vsub.f32 %v484_v44, %v597_v59 }
 0x163   :  { %629 = vst [vmem:[#allocation4 + $0x38] sm:$0xff] %v613_v60 }
 0x164   :  { %v551_v62 = vpop.permute.xlu2 %550 }
 0x165   :  { %v584_v28 = vmul.f32 %v551_v62, %v198_v27 }
 0x167   :  { %v601_v3 = vmul.f32 %v1118_v47, %v584_v28 }
 0x169   :  { %v617_v5 = vsub.f32 %v488_v63, %v601_v3 }
 0x16b   :  { %633 = vst [vmem:[#allocation4 + $0x58] sm:$0xff] %v617_v5 }
 0x16c   :  { %v541_v4 = vpop.permute.xlu0 %540 }
 0x16d   :  { %v582_v18 = vmul.f32 %v541_v4, %v193_v40 }
 0x16f   :  { %v599_v7 = vmul.f32 %v1118_v47, %v582_v18 }
 0x171   :  { %v615_v10 = vsub.f32 %v486_v20, %v599_v7 }
 0x173   :  { %631 = vst [vmem:[#allocation4 + $0x48] sm:$0xff] %v615_v10 }
 0x174   :  { %v546_v19 = vpop.permute.xlu1 %545 }
 0x175   :  { %v583_v24 = vmul.f32 %v546_v19, %v196_v50 }
 0x177   :  { %v600_v25 = vmul.f32 %v1118_v47, %v583_v24 }
 0x179   :  { %v616_v26 = vsub.f32 %v487_v22, %v600_v25 }
 0x17b   :  { %632 = vst [vmem:[#allocation4 + $0x50] sm:$0xff] %v616_v26 }
 0x17c   :  { %v566_v31 = vpop.permute.xlu2 %565 }
 0x17d   :  { %v587_v17 = vmul.f32 %v566_v31, %v206_v29 }
 0x17f   :  { %v604_v32 = vmul.f32 %v1118_v47, %v587_v17 }
 0x181   :  { %v620_v21 = vsub.f32 %v491_v12, %v604_v32 }
 0x183   :  { %636 = vst [vmem:[#allocation4 + $0x70] sm:$0xff] %v620_v21 }
 0x184   :  { %v556_v33 = vpop.permute.xlu0 %555 }
 0x185   :  { %v585_v34 = vmul.f32 %v556_v33, %v201_v0 }
 0x187   :  { %v602_v35 = vmul.f32 %v1118_v47, %v585_v34 }
 0x189   :  { %v618_v36 = vsub.f32 %v489_v8, %v602_v35 }
 0x18b   :  { %634 = vst [vmem:[#allocation4 + $0x60] sm:$0xff] %v618_v36 }
 0x18c   :  { %v561_v40 = vpop.permute.xlu1 %560 }
 0x18d   :  { %v586_v13 = vmul.f32 %v561_v40, %v203_v57 }
 0x18f   :  { %v603_v41 = vmul.f32 %v1118_v47, %v586_v13 }
 0x191   :  { %v619_v43 = vsub.f32 %v490_v15, %v603_v41 }
 0x193   :  { %635 = vst [vmem:[#allocation4 + $0x68] sm:$0xff] %v619_v43 }
 0x19c   :  { %v571_v46 = vpop.permute.xlu0 %570 }
 0x19d   :  { %v588_v16 = vmul.f32 %v571_v46, %v208_v39 }
 0x19f   :  { %v605_v50 = vmul.f32 %v1118_v47, %v588_v16 }
 0x1a1   :  { %v621_v37 = vsub.f32 %v492_v48, %v605_v50 }
 0x1a3   :  { %637 = vst [vmem:[#allocation4 + $0x78] sm:$0xff] %v621_v37 }
 0x1a4   :  { %650 = dma.vmem_to_hbm [thread:$0]  %s643_s12, 2048, %s645_s15, [#allocation5], %s835_s16, %s835_s16, %s836_s17  }
 0x1a5   :  { %828 = dma.done.wait [#allocation5], 2048  }
 0x1a6   :  { %829 = vsyncadd [#allocation5], 4294965248 }
 0x1a7   :  { %655 = vsyncpa [#allocation5], 1 }

</bundles_post_ra>
